<compile_context>
chip_gen: v5e
topology: v5e:2x2
jax: 0.10.0
libtpu: 0.0.40
codegen_flags: <defaults>
</compile_context>

<pallas_src>
import functools

import jax
import jax.numpy as jnp
from jax import lax
from jax.experimental import pallas as pl
from jax.experimental.pallas import tpu as pltpu


# ----------------------------------------------------------------------------
# Fused kernel: fc_key+ReLU, fc_query+ReLU, scaled dot, softmax, weighted sum
#   v_ref : (Bblk, L, Din)  bf16 (or f32)    h_ref : (Bblk, 1, Dqin) f32
#   wk_ref: (Din, Dk) bf16                   bk_ref: (1, Dk) f32
#   wq_ref: (Dqin, Dq) bf16  (pre-scaled)    bq_ref: (1, Dq) f32 (pre-scaled)
#   out_ref: (1, Bblk, Din) f32              sm_ref: (1, Bblk, L) f32
# ----------------------------------------------------------------------------
def scaled_dot_attn_kernel(v_ref, h_ref, wk_ref, bk_ref, wq_ref, bq_ref,
                           out_ref, sm_ref):
    Bblk, L, Din = v_ref.shape

    v = v_ref[...].astype(jnp.bfloat16)                 # no-op if already bf16
    v_flat = v.reshape(Bblk * L, Din)                   # one big key-projection LHS

    # key = relu(value @ Wk^T + bk) — single flattened MXU matmul, f32 accumulate
    key = jnp.dot(v_flat, wk_ref[...], preferred_element_type=jnp.float32)
    key = jnp.maximum(key + bk_ref[...], 0.0)           # f32 elementwise (VPU)
    key = key.reshape(Bblk, L, -1).astype(jnp.bfloat16)  # (Bblk, L, Dk)

    # query = relu(h @ (Wq^T / sqrt(Dk)) + bq / sqrt(Dk))  — scale pre-folded
    h2 = h_ref[...].reshape(Bblk, -1).astype(jnp.bfloat16)
    q = jnp.dot(h2, wq_ref[...], preferred_element_type=jnp.float32)
    q = jnp.maximum(q + bq_ref[...], 0.0)                # (Bblk, Dq) f32
    q3 = q.reshape(Bblk, 1, -1).astype(jnp.bfloat16)     # (Bblk, 1, Dq)

    # scaled scores: batched dot_general, no explicit key transpose
    scores = jnp.einsum("bqd,bkd->bqk", q3, key,
                        preferred_element_type=jnp.float32)   # (Bblk, 1, L)

    # numerically-stable softmax over the sequence axis (lane axis), f32
    m = jnp.max(scores, axis=-1, keepdims=True)
    e = jnp.exp(scores - m)
    p = e * pl.reciprocal(jnp.sum(e, axis=-1, keepdims=True), approx=True)

    sm_ref[0] = p.reshape(Bblk, L)                       # one (Bblk, L) slab store

    # weighted_lang_t_instr = sum_L(softmax * value) — batched (1,L)@(L,Din) MXU
    out = jnp.einsum("bqk,bkd->bqd", p.astype(jnp.bfloat16), v,
                     preferred_element_type=jnp.float32)      # (Bblk, 1, Din)
    out_ref[0] = out.reshape(Bblk, Din)


# ----------------------------------------------------------------------------
# Wrapper
# ----------------------------------------------------------------------------
@functools.partial(jax.jit, static_argnames=("block_b",))
def scaled_dot_attn(value, h, wk, bk, wq, bq, *, block_b=None):
    """value: (B, L, Din) bf16/f32; h: (B, Dqin) f32.
    wk: (Din, Dk) bf16; bk: (1, Dk) f32; wq: (Dqin, Dq) bf16 (scale folded);
    bq: (1, Dq) f32 (scale folded).
    Returns (weighted (B, Din) f32, softmax (B, L) f32)."""
    B, L, Din = value.shape
    Dqin = h.shape[-1]
    Dk = wk.shape[-1]
    Dq = wq.shape[-1]

    if block_b is None:
        # Keep >=2 parallel grid steps when B allows it (v7x megacore), otherwise
        # a single step; cap Bblk so the streamed value block (double-buffered)
        # stays well inside scoped VMEM on every generation (incl. v7x 64 MiB).
        vmem_budget = 4 * 1024 * 1024  # bytes per value block
        max_bblk = max(1, vmem_budget // max(1, L * Din * value.dtype.itemsize))
        block_b = min(-(-B // 2), max_bblk) if B > 1 else 1
    nb = -(-B // block_b)  # cdiv

    # keep last-two block dims full-extent (legal (8,128) tiling)
    h3 = h.reshape(B, 1, Dqin)

    out3, sm3 = pl.pallas_call(
        scaled_dot_attn_kernel,
        grid=(nb,),
        in_specs=[
            pl.BlockSpec((block_b, L, Din), lambda b: (b, 0, 0)),   # value (streamed)
            pl.BlockSpec((block_b, 1, Dqin), lambda b: (b, 0, 0)),  # h
            pl.BlockSpec((Din, Dk), lambda b: (0, 0)),              # Wk (resident)
            pl.BlockSpec((1, Dk), lambda b: (0, 0)),                # bk
            pl.BlockSpec((Dqin, Dq), lambda b: (0, 0)),             # Wq (resident)
            pl.BlockSpec((1, Dq), lambda b: (0, 0)),                # bq
        ],
        out_specs=(
            pl.BlockSpec((1, block_b, Din), lambda b: (b, 0, 0)),   # weighted sum
            pl.BlockSpec((1, block_b, L), lambda b: (b, 0, 0)),     # softmax weights
        ),
        out_shape=(
            jax.ShapeDtypeStruct((nb, block_b, Din), jnp.float32),
            jax.ShapeDtypeStruct((nb, block_b, L), jnp.float32),
        ),
        compiler_params=pltpu.CompilerParams(
            dimension_semantics=("parallel",),   # batch-block axis shards across TCs
        ),
    )(value, h3, wk, bk, wq, bq)

    weighted = out3.reshape(nb * block_b, Din)[:B]
    sm = sm3.reshape(nb * block_b, L)[:B]
    return weighted, sm


# ----------------------------------------------------------------------------
# One-time parameter prep (hoisted out of the per-call hot path):
# PyTorch nn.Linear weight (out, in) -> (in, out), cast to bf16 for the MXU;
# biases reshaped to (1, out) rows; 1/sqrt(Dk) folded into the query projection
# (legal since relu(c*x) == c*relu(x) for c > 0).
# ----------------------------------------------------------------------------
def prepare_kernel_params(params):
    dk = params["fc_key_w"].shape[0]                 # == key.shape[-1]
    inv_scale = 1.0 / (float(dk) ** 0.5)
    return {
        "wk": jnp.asarray(params["fc_key_w"].T, jnp.bfloat16),
        "bk": params["fc_key_b"].reshape(1, -1).astype(jnp.float32),
        "wq": jnp.asarray(params["fc_query_w"].T * inv_scale, jnp.bfloat16),
        "bq": (params["fc_query_b"] * inv_scale).reshape(1, -1).astype(jnp.float32),
    }


# ----------------------------------------------------------------------------
# Pure-JAX reference reproducing the PyTorch forward (f32, highest precision)
# ----------------------------------------------------------------------------
def reference_forward(value, h, params):
    hp = lax.Precision.HIGHEST
    key = jnp.einsum("bld,od->blo", value, params["fc_key_w"], precision=hp)
    key = jnp.maximum(key + params["fc_key_b"], 0.0)
    query = jnp.einsum("bd,od->bo", h, params["fc_query_w"], precision=hp)
    query = jnp.maximum(query + params["fc_query_b"], 0.0)
    scale = float(key.shape[-1]) ** 0.5
    scores = jnp.einsum("blo,bo->bl", key, query, precision=hp) / scale
    sm = jax.nn.softmax(scores, axis=1)
    weighted = jnp.sum(value * sm[..., None], axis=1)
    return weighted, sm


def make_params(key, dim_key_in, dim_key_out, dim_query_in, dim_query_out):
    ks = jax.random.split(key, 4)
    lim_k = 1.0 / (float(dim_key_in) ** 0.5)      # PyTorch nn.Linear default init range
    lim_q = 1.0 / (float(dim_query_in) ** 0.5)
    return {
        "fc_key_w": jax.random.uniform(ks[0], (dim_key_out, dim_key_in), jnp.float32, -lim_k, lim_k),
        "fc_key_b": jax.random.uniform(ks[1], (dim_key_out,), jnp.float32, -lim_k, lim_k),
        "fc_query_w": jax.random.uniform(ks[2], (dim_query_out, dim_query_in), jnp.float32, -lim_q, lim_q),
        "fc_query_b": jax.random.uniform(ks[3], (dim_query_out,), jnp.float32, -lim_q, lim_q),
    }


if __name__ == "__main__":
    B, L = 2, 16
    DIM_KEY_IN = DIM_QUERY_IN = 256
    DIM_KEY_OUT = DIM_QUERY_OUT = 128

    root = jax.random.PRNGKey(0)
    kv, kh, kp = jax.random.split(root, 3)
    value = jax.random.normal(kv, (B, L, DIM_KEY_IN), jnp.float32)
    h = jax.random.normal(kh, (B, DIM_QUERY_IN), jnp.float32)

    params = make_params(kp, DIM_KEY_IN, DIM_KEY_OUT, DIM_QUERY_IN, DIM_QUERY_OUT)
    kparams = prepare_kernel_params(params)

    # Upstream producer emits bf16 for the large streamed input (halves the DMA);
    # the kernel itself accepts either bf16 or f32 value.
    value_bf16 = value.astype(jnp.bfloat16)

    weighted, sm = scaled_dot_attn(value_bf16, h, kparams["wk"], kparams["bk"],
                                   kparams["wq"], kparams["bq"])
    jax.block_until_ready((weighted, sm))

    ref_w, ref_s = reference_forward(value, h, params)

    assert weighted.shape == (B, DIM_KEY_IN), weighted.shape
    assert sm.shape == (B, L), sm.shape
    err_w = float(jnp.max(jnp.abs(weighted - ref_w)))
    err_s = float(jnp.max(jnp.abs(sm - ref_s)))
    assert jnp.allclose(weighted, ref_w, rtol=2e-2, atol=2e-2), f"weighted max abs err = {err_w}"
    assert jnp.allclose(sm, ref_s, rtol=2e-2, atol=2e-2), f"softmax max abs err = {err_s}"
    print("KERNEL_OK")
</pallas_src>

<mosaic_0001>
module attributes {stable_mosaic.version = 11 : i64} {
  func.func @scaled_dot_attn_kernel(%arg0: i32, %arg1: memref<1x16x256xbf16, #tpu.memory_space<vmem>>, %arg2: memref<1x1x256xf32, #tpu.memory_space<vmem>>, %arg3: memref<256x128xbf16, #tpu.memory_space<vmem>>, %arg4: memref<1x128xf32, #tpu.memory_space<vmem>>, %arg5: memref<256x128xbf16, #tpu.memory_space<vmem>>, %arg6: memref<1x128xf32, #tpu.memory_space<vmem>>, %arg7: memref<1x1x256xf32, #tpu.memory_space<vmem>>, %arg8: memref<1x1x16xf32, #tpu.memory_space<vmem>>) attributes {dimension_semantics = [#tpu.dimension_semantics<parallel>], iteration_bounds = array<i64: 2>, scalar_prefetch = 0 : i64, scratch_operands = 0 : i64, tpu.core_type = #tpu.core_type<tc>, window_params = [{transform_indices = @transform_0, window_bounds = array<i64: 1, 16, 256>}, {transform_indices = @transform_1, window_bounds = array<i64: 1, 1, 256>}, {pipeline_mode = #tpu.pipeline_mode<synchronous>, transform_indices = @transform_2, window_bounds = array<i64: 256, 128>}, {pipeline_mode = #tpu.pipeline_mode<synchronous>, transform_indices = @transform_3, window_bounds = array<i64: 1, 128>}, {pipeline_mode = #tpu.pipeline_mode<synchronous>, transform_indices = @transform_4, window_bounds = array<i64: 256, 128>}, {pipeline_mode = #tpu.pipeline_mode<synchronous>, transform_indices = @transform_5, window_bounds = array<i64: 1, 128>}, {transform_indices = @transform_6, window_bounds = array<i64: 1, 1, 256>}, {transform_indices = @transform_7, window_bounds = array<i64: 1, 1, 16>}]} {
    %c0 = arith.constant 0 : index
    %c0_0 = arith.constant 0 : index
    %c0_1 = arith.constant 0 : index
    %0 = vector.load %arg1[%c0, %c0_0, %c0_1] : memref<1x16x256xbf16, #tpu.memory_space<vmem>>, vector<1x16x256xbf16>
    %1 = vector.shape_cast %0 : vector<1x16x256xbf16> to vector<16x256xbf16>
    %c0_2 = arith.constant 0 : index
    %c0_3 = arith.constant 0 : index
    %2 = vector.load %arg3[%c0_2, %c0_3] : memref<256x128xbf16, #tpu.memory_space<vmem>>, vector<256x128xbf16>
    %cst = arith.constant dense<0.000000e+00> : vector<16x128xf32>
    %3 = tpu.matmul %1, %2, %cst {dimension_numbers = #tpu.dot_dimension_numbers<[1], [0], [0], [1], [0, 0, 1, 1], [], []>} : vector<16x256xbf16>, vector<256x128xbf16>, vector<16x128xf32> -> vector<16x128xf32>
    %c0_4 = arith.constant 0 : index
    %c0_5 = arith.constant 0 : index
    %4 = vector.load %arg4[%c0_4, %c0_5] : memref<1x128xf32, #tpu.memory_space<vmem>>, vector<1x128xf32>
    %5 = vector.broadcast %4 : vector<1x128xf32> to vector<16x128xf32>
    %6 = arith.addf %3, %5 : vector<16x128xf32>
    %cst_6 = arith.constant 0.000000e+00 : f32
    %7 = vector.broadcast %cst_6 : f32 to vector<16x128xf32>
    %8 = arith.maximumf %6, %7 : vector<16x128xf32>
    %9 = vector.shape_cast %8 : vector<16x128xf32> to vector<1x16x128xf32>
    %10 = arith.truncf %9 : vector<1x16x128xf32> to vector<1x16x128xbf16>
    %c0_7 = arith.constant 0 : index
    %c0_8 = arith.constant 0 : index
    %c0_9 = arith.constant 0 : index
    %11 = vector.load %arg2[%c0_7, %c0_8, %c0_9] : memref<1x1x256xf32, #tpu.memory_space<vmem>>, vector<1x1x256xf32>
    %12 = vector.shape_cast %11 : vector<1x1x256xf32> to vector<1x256xf32>
    %13 = arith.truncf %12 : vector<1x256xf32> to vector<1x256xbf16>
    %c0_10 = arith.constant 0 : index
    %c0_11 = arith.constant 0 : index
    %14 = vector.load %arg5[%c0_10, %c0_11] : memref<256x128xbf16, #tpu.memory_space<vmem>>, vector<256x128xbf16>
    %cst_12 = arith.constant dense<0.000000e+00> : vector<1x128xf32>
    %15 = tpu.matmul %13, %14, %cst_12 {dimension_numbers = #tpu.dot_dimension_numbers<[1], [0], [0], [1], [0, 0, 1, 1], [], []>} : vector<1x256xbf16>, vector<256x128xbf16>, vector<1x128xf32> -> vector<1x128xf32>
    %c0_13 = arith.constant 0 : index
    %c0_14 = arith.constant 0 : index
    %16 = vector.load %arg6[%c0_13, %c0_14] : memref<1x128xf32, #tpu.memory_space<vmem>>, vector<1x128xf32>
    %17 = arith.addf %15, %16 : vector<1x128xf32>
    %cst_15 = arith.constant 0.000000e+00 : f32
    %18 = vector.broadcast %cst_15 : f32 to vector<1x128xf32>
    %19 = arith.maximumf %17, %18 : vector<1x128xf32>
    %20 = vector.shape_cast %19 : vector<1x128xf32> to vector<1x1x128xf32>
    %21 = arith.truncf %20 : vector<1x1x128xf32> to vector<1x1x128xbf16>
    "tpu.trace_start"() <{level = 10 : i32, message = "bqd,bkd->bqk"}> : () -> ()
    %cst_16 = arith.constant dense<0.000000e+00> : vector<1x1x16xf32>
    %22 = tpu.matmul %21, %10, %cst_16 {dimension_numbers = #tpu.dot_dimension_numbers<[2], [2], [1], [1], [0, 0, 0, 1, 1, 1], [0], [0]>} : vector<1x1x128xbf16>, vector<1x16x128xbf16>, vector<1x1x16xf32> -> vector<1x1x16xf32>
    "tpu.trace_stop"() : () -> ()
    %cst_17 = arith.constant dense<0xFF800000> : vector<1x1xf32>
    %23 = vector.multi_reduction <maximumf>, %22, %cst_17 [2] : vector<1x1x16xf32> to vector<1x1xf32>
    %24 = vector.shape_cast %23 : vector<1x1xf32> to vector<1x1x1xf32>
    %25 = vector.broadcast %24 : vector<1x1x1xf32> to vector<1x1x16xf32>
    %26 = arith.subf %22, %25 : vector<1x1x16xf32>
    %27 = math.exp %26 : vector<1x1x16xf32>
    %cst_18 = arith.constant dense<0.000000e+00> : vector<1x1xf32>
    %28 = vector.multi_reduction <add>, %27, %cst_18 [2] : vector<1x1x16xf32> to vector<1x1xf32>
    %29 = vector.shape_cast %28 : vector<1x1xf32> to vector<1x1x1xf32>
    %30 = tpu.reciprocal %29 {approx = true} : vector<1x1x1xf32> -> vector<1x1x1xf32>
    %31 = vector.broadcast %30 : vector<1x1x1xf32> to vector<1x1x16xf32>
    %32 = arith.mulf %27, %31 : vector<1x1x16xf32>
    %33 = vector.shape_cast %32 : vector<1x1x16xf32> to vector<1x16xf32>
    %c0_19 = arith.constant 0 : index
    %c0_20 = arith.constant 0 : index
    %c0_21 = arith.constant 0 : index
    %34 = vector.load %arg8[%c0_19, %c0_20, %c0_21] : memref<1x1x16xf32, #tpu.memory_space<vmem>>, vector<1x1x16xf32>
    %35 = vector.shape_cast %34 : vector<1x1x16xf32> to vector<1x16xf32>
    %36 = vector.shape_cast %33 : vector<1x16xf32> to vector<1x1x16xf32>
    tpu.vector_store %arg8[%c0_19, %c0_20, %c0_21], %36 {strides = array<i32>} : memref<1x1x16xf32, #tpu.memory_space<vmem>>, vector<1x1x16xf32>,
    %37 = arith.truncf %32 : vector<1x1x16xf32> to vector<1x1x16xbf16>
    "tpu.trace_start"() <{level = 10 : i32, message = "bqk,bkd->bqd"}> : () -> ()
    %cst_22 = arith.constant dense<0.000000e+00> : vector<1x1x256xf32>
    %38 = tpu.matmul %37, %0, %cst_22 {dimension_numbers = #tpu.dot_dimension_numbers<[2], [1], [1], [2], [0, 0, 0, 1, 1, 2], [0], [0]>} : vector<1x1x16xbf16>, vector<1x16x256xbf16>, vector<1x1x256xf32> -> vector<1x1x256xf32>
    "tpu.trace_stop"() : () -> ()
    %39 = vector.shape_cast %38 : vector<1x1x256xf32> to vector<1x256xf32>
    %c0_23 = arith.constant 0 : index
    %c0_24 = arith.constant 0 : index
    %c0_25 = arith.constant 0 : index
    %40 = vector.load %arg7[%c0_23, %c0_24, %c0_25] : memref<1x1x256xf32, #tpu.memory_space<vmem>>, vector<1x1x256xf32>
    %41 = vector.shape_cast %40 : vector<1x1x256xf32> to vector<1x256xf32>
    %42 = vector.shape_cast %39 : vector<1x256xf32> to vector<1x1x256xf32>
    tpu.vector_store %arg7[%c0_23, %c0_24, %c0_25], %42 {strides = array<i32>} : memref<1x1x256xf32, #tpu.memory_space<vmem>>, vector<1x1x256xf32>,
    return
  }
  func.func @transform_0(%arg0: i32) -> (i32, i32, i32) {
    %c0_i32 = arith.constant 0 : i32
    %c0_i32_0 = arith.constant 0 : i32
    %c0_i32_1 = arith.constant 0 : i32
    return %arg0, %c0_i32, %c0_i32_0 : i32, i32, i32
  }
  func.func @transform_1(%arg0: i32) -> (i32, i32, i32) {
    %c0_i32 = arith.constant 0 : i32
    %c0_i32_0 = arith.constant 0 : i32
    %c0_i32_1 = arith.constant 0 : i32
    return %arg0, %c0_i32, %c0_i32_0 : i32, i32, i32
  }
  func.func @transform_2(%arg0: i32) -> (i32, i32) {
    %c0_i32 = arith.constant 0 : i32
    %c0_i32_0 = arith.constant 0 : i32
    %c0_i32_1 = arith.constant 0 : i32
    return %c0_i32, %c0_i32_0 : i32, i32
  }
  func.func @transform_3(%arg0: i32) -> (i32, i32) {
    %c0_i32 = arith.constant 0 : i32
    %c0_i32_0 = arith.constant 0 : i32
    %c0_i32_1 = arith.constant 0 : i32
    return %c0_i32, %c0_i32_0 : i32, i32
  }
  func.func @transform_4(%arg0: i32) -> (i32, i32) {
    %c0_i32 = arith.constant 0 : i32
    %c0_i32_0 = arith.constant 0 : i32
    %c0_i32_1 = arith.constant 0 : i32
    return %c0_i32, %c0_i32_0 : i32, i32
  }
  func.func @transform_5(%arg0: i32) -> (i32, i32) {
    %c0_i32 = arith.constant 0 : i32
    %c0_i32_0 = arith.constant 0 : i32
    %c0_i32_1 = arith.constant 0 : i32
    return %c0_i32, %c0_i32_0 : i32, i32
  }
  func.func @transform_6(%arg0: i32) -> (i32, i32, i32) {
    %c0_i32 = arith.constant 0 : i32
    %c0_i32_0 = arith.constant 0 : i32
    %c0_i32_1 = arith.constant 0 : i32
    return %arg0, %c0_i32, %c0_i32_0 : i32, i32, i32
  }
  func.func @transform_7(%arg0: i32) -> (i32, i32, i32) {
    %c0_i32 = arith.constant 0 : i32
    %c0_i32_0 = arith.constant 0 : i32
    %c0_i32_1 = arith.constant 0 : i32
    return %arg0, %c0_i32, %c0_i32_0 : i32, i32, i32
  }
}

</mosaic_0001>

<bundles_post_ra>
// kernel: scaled_dot_attn.1
= control target key start
LH: loop header
LB: loop body
LE: loop exit
PB: predicated region body
PF: predicated region fallthrough
CT: control target
= control target key end

     0   :  { %s1561_s0 = inlined_call_operand.hbm [shape: bf16[2,16,256], index: 0, kind: input, shape index: {}]   ;;  %s1562_s1 = inlined_call_operand.vmem [shape: f32[2,1,256], index: 1, kind: input, shape index: {}]   ;;  %s1563_s2 = inlined_call_operand.hbm [shape: bf16[256,128], index: 2, kind: input, shape index: {}]   ;;  %s1564_s3 = inlined_call_operand.vmem [shape: f32[1,128], index: 3, kind: input, shape index: {}]   ;;  %s1565_s4 = inlined_call_operand.hbm [shape: bf16[256,128], index: 4, kind: input, shape index: {}]   ;;  %s1566_s5 = inlined_call_operand.vmem [shape: f32[1,128], index: 5, kind: input, shape index: {}]   ;;  %s1567_s6 = inlined_call_operand.vmem [shape: f32[2,1,256], index: 6, kind: output, shape index: {0}]   ;;  %s1568_s7 = inlined_call_operand.hbm [shape: f32[2,1,16], index: 7, kind: output, shape index: {1}]  }
   0x1   :  { %1570 = sst [smem:[#allocation12_spill]] %s1561_s0 }
   0x2   :  { %1571 = sst [smem:[#allocation13_spill]] %s1563_s2 }
   0x3   :  { %13 = vsyncpa [#allocation3], 0 }
   0x4   :  { %15 = vsyncpa [#allocation3 + $0x1], 0 }
   0x5   :  { %16 = vsyncpa [#allocation6], 0 }
   0x6   :  { %17 = vsyncpa [#allocation4], 0 }
   0x7   :  { %19 = vsyncpa [#allocation4 + $0x1], 0  ;;  %s1389_s24 = smov 0   ;;  %s1391_s25 = smov 0  }
   0x8   :  { %s1393_s26 = smov 0   ;;  %s1395_s27 = smov 0  }
   0x9 LB: > { %s1410_s28 = sadd.s32 4294967295, %s1341_s27   ;;  %s916_s29 = sadd.s32 4294967294, %s1341_s27   ;;  %s1341_s27 = sphi %s1395_s27, %s1584_s27   ;;  %s1337_s26 = sphi %s1393_s26, %s1583_s26   ;;  %s1333_s25 = sphi %s1391_s25, %s1582_s25   ;;  %s1329_s24 = sphi %s1389_s24, %s1581_s24  }
   0xa   : > { %p45_p0 = scmp.ne.s32.totalorder %s1333_s25, %s1329_s24  ;;  %p46_p1 = scmp.eq.s32.totalorder %s1410_s28, 0 }
   0xb   : > { %p205_p2 = scmp.eq.s32.totalorder %s1410_s28, 1  ;;  %p211_p3 = scmp.eq.s32.totalorder %s916_s29, 1 }
   0xc   : > { %p1419_p4 = por %p46_p1, %p45_p0  ;;  %p917_p5 = scmp.ge.s32.totalorder %s1341_s27, 1 }
   0xd   : > { %p1424_p6 = por %p211_p3, %p45_p0  ;;  %p218_p7 = scmp.lt.s32.totalorder %s1341_s27, 3 }
   0xe   : > { %s1574_s2 = sld [smem:[#allocation13_spill]]  ;;  %s1343_s13 = smov [#allocation5]  }
   0xf   : > { %p1432_p8 = pnand %p917_p5, %p218_p7  ;;  %s231_s14 = sshll.u32 %s1343_s13, 4  ;;  %s232_s14 = int_to_ptr.vmem [resolvable:$true] %s231_s14 }
  0x10   : > { %s246_s17 = sshll.u32 %s1565_s4, 4  ;;  %s1344_s18 = smov 64   ;;  %s247_s17 = int_to_ptr.hbm [resolvable:$true] %s246_s17 }
  0x11   : > { %p1117_p9 = pneg %p1432_p8  ;;  %s1345_s19 = smov 4  }
  0x12   : > { %s1346_s20 = smov [#allocation7]   ;;  %s1445_s22 = sadd.s32 1, %s1341_s27  }
  0x13   : > { %p1118_p10 = pnand %p1117_p9, %p46_p1  ;;  %s248_s21 = sshll.u32 %s1346_s20, 4  ;;  %s249_s21 = int_to_ptr.vmem [resolvable:$true] %s248_s21 }
  0x14   : > { %s229_s11 = sshll.u32 %s1574_s2, 4  ;;  %s32_s23 = sadd.s32 1, %s1337_s26  ;;  %s230_s11 = int_to_ptr.hbm [resolvable:$true] %s229_s11 }
  0x15   : > { %1120 = dma.hbm_to_vmem [thread:$0]  (!%p1118_p10), %s230_s11, 2048, %s232_s14, [#allocation6], %s1344_s18, %s1344_s18, %s1345_s19  }
  0x16   : > { %1123 = dma.hbm_to_vmem [thread:$0]  (!%p1118_p10), %s247_s17, 2048, %s249_s21, [#allocation6], %s1344_s18, %s1344_s18, %s1345_s19  }
  0x17   : > { %s29_s29 = ssub.s32 %s1341_s27, %s1445_s22  ;;  %p39_p12 = scmp.ne.s32.totalorder %s1337_s26, %s1333_s25 }
  0x18   : > { %p30_p13 = scmp.eq.s32.totalorder %s29_s29, 0  ;;  %p40_p0 = scmp.eq.s32.totalorder %s1341_s27, 0 }
  0x19   : > { %p1455_p3 = por %p205_p2, %p39_p12  ;;  %p1134_p5 = scmp.lt.s32.totalorder %s1341_s27, 2 }
  0x1a   : > { %s1461_s10 = scalar_select %p30_p13, %s1337_s26, %s32_s23  }
  0x1b   : > { %p41_p7 = por %p40_p0, %p39_p12  ;;  %s265_s11 = sand.u32 1, %s1337_s26  }
  0x1c   : > { %s921_s13 = sshll.u32 %s265_s11, 4  ;;  %s1070_s14 = sshll.u32 %s1341_s27, 4 }
  0x1d   : > { %s1577_s0 = sld [smem:[#allocation12_spill]]  ;;  %s269_s18 = scalar_lea.vmem [#allocation2], %s921_s13 }
  0x1e   : > { %s277_s19 = sshll.u32 %s269_s18, 4  ;;  %p1468_p2 = pnand %p1134_p5, %p41_p7  ;;  %s278_s19 = int_to_ptr.vmem [resolvable:$true] %s277_s19 }
  0x1f   : > { %s266_s23 = scalar_lea.sflag [#allocation3], %s265_s11 }
  0x20   : > { %p1245_p10 = pneg %p1468_p2 }
  0x23   : > { %s274_s17 = scalar_lea.hbm %s1577_s0, %s1070_s14  ;;  %s1248_s15 = scalar_lea.hbm %s1577_s0, 32 }
  0x24   : > { %s275_s20 = sshll.u32 %s274_s17, 4  ;;  %s276_s20 = int_to_ptr.hbm [resolvable:$true] %s275_s20 }
  0x25   : > { %s1241_s29 = sshra.s32 %s276_s20, 4  ;;  %s1242_s29 = int_to_ptr.hbm [resolvable:$true] %s1241_s29 }
  0x26   : > { %s1243_s2 = scalar_lea.hbm %s1242_s29, 16  ;;  %p1249_p0 = scmp.lt.s32.totalorder %s1242_s29, %s1577_s0 }
  0x27   : > { %p1244_p9 = scmp.ne.s32.totalorder %s1242_s29, %s1243_s2  ;;  %p1250_p5 = scmp.lt.s32.totalorder %s1248_s15, %s1243_s2 }
  0x29   : > { %p1246_p12 = pnand %p1245_p10, %p1244_p9  ;;  %p1251_p7 = por %p1250_p5, %p1249_p0 }
  0x2b   : > { %p1247_p13 = pneg %p1246_p12 }
  0x2d   : > { %p1252_p11 = pnand %p1251_p7, %p1247_p13 }
  0x2f   : > { %1255 = shalt.err (!%p1252_p11)
}
  0x30   : > { %s1347_s11 = smov 128   ;;  %s1348_s18 = smov 8  }
  0x31   : > { %1127 = dma.hbm_to_vmem [thread:$0]  (!%p1468_p2), %s276_s20, 256, %s278_s19, %s266_s23, %s1347_s11, %s1347_s11, %s1348_s18  }
  0x32   : > { %296 = sbr.rel (%p1432_p8) target bundleno = 765 (0x2fd), region = 44  ;;  %s1485_s14 = sand.u32 (!%p1432_p8), 1, %s1333_s25  }
  0x33   : > { %s925_s13 = sshll.u32 (!%p1432_p8), %s1485_s14, 4  ;;  %s299_s29 = scalar_lea.sflag (!%p1432_p8), [#allocation3], %s1485_s14 }
  0x34   : > { %s1489_s2 = scalar_lea.vmem (!%p1432_p8), [#allocation2], %s925_s13 }
  0x37   : > { %1316 = dma.done.wait (%p1419_p4), %s299_s29, 256  }
  0x38   : > { %1318 = vsyncadd (%p1419_p4), %s299_s29, 4294967040 }
  0x39   : > { %1320 = dma.done.wait (%p46_p1), [#allocation6], 4096  }
  0x3a   : > { %1322 = vsyncadd (%p46_p1), [#allocation6], 4294963200  ;;  %v1080_v0 = vld [vmem:[#allocation5 + $0x38] sm:$0xff]  ;;  %v1079_v2 = vld [vmem:[#allocation5 + $0x30] sm:$0xff]  ;;  %p351_p1 = scmp.lt.s32.totalorder %s1410_s28, 1  ;;  %vm720_vm0 = vcmask 122880   ;;  %s791_s29 = scalar_lea.hbm %s1568_s7, %s1410_s28 }
  0x3b   : > { %v1088_v1 = vld [vmem:[#allocation5 + $0x78] sm:$0xff]  ;;  %504 = vmatpush.bf16.msra.mxu0 %v1080_v0  ;;  %v1087_v3 = vld [vmem:[#allocation5 + $0x70] sm:$0xff]  ;;  %v1078_v8 = vld [vmem:[#allocation5 + $0x28] sm:$0xff]  ;;  %vm734_vm1 = vcmask 130048   ;;  %s350_s11 = scalar_lea.vmem [#allocation8], %s1485_s14  ;;  %s795_s19 = sshll.u32 %s791_s29, 4  ;;  %s796_s19 = int_to_ptr.hbm [resolvable:$true] %s795_s19 }
  0x3c   : > { %518 = vmatpush.bf16.msra.mxu1 %v1088_v1  ;;  %v1096_v4 = vld [vmem:[#allocation7 + $0x38] sm:$0xff]  ;;  %v1095_v6 = vld [vmem:[#allocation7 + $0x30] sm:$0xff]  ;;  %v1086_v9 = vld [vmem:[#allocation5 + $0x68] sm:$0xff]  ;;  %s1501_s30 = scalar_select %p351_p1, %s1410_s28, 1 }
  0x3d   : > { %v1104_v5 = vld [vmem:[#allocation7 + $0x78] sm:$0xff]  ;;  %673 = vmatpush.bf16.msra.mxu2 %v1096_v4  ;;  %v1103_v7 = vld [vmem:[#allocation7 + $0x70] sm:$0xff]  ;;  %v1094_v10 = vld [vmem:[#allocation7 + $0x28] sm:$0xff]  ;;  %s780_s20 = scalar_lea.sflag [#allocation4], %s1485_s14  ;;  %s1291_s17 = scalar_lea.hbm %s1568_s7, 2 }
  0x3e   : > { %686 = vmatpush.bf16.msra.mxu3 %v1104_v5  ;;  %v1102_v11 = vld [vmem:[#allocation7 + $0x68] sm:$0xff]  ;;  %v1077_v12 = vld [vmem:[#allocation5 + $0x20] sm:$0xff]  ;;  %v1076_v16 = vld [vmem:[#allocation5 + $0x18] sm:$0xff]  ;;  %s1569_s12 = sshll.u32 %s1501_s30, 1 }
  0x3f   : > { %505 = vmatpush.bf16.msra.mxu0 %v1079_v2  ;;  %v1085_v13 = vld [vmem:[#allocation5 + $0x60] sm:$0xff]  ;;  %v1084_v17 = vld [vmem:[#allocation5 + $0x58] sm:$0xff]  ;;  %v1075_v20 = vld [vmem:[#allocation5 + $0x10] sm:$0xff]  ;;  %s354_s21 = scalar_lea.vmem %s1562_s1, %s1569_s12 }
  0x40   : > { %519 = vmatpush.bf16.msra.mxu1 %v1087_v3  ;;  %v1093_v14 = vld [vmem:[#allocation7 + $0x20] sm:$0xff]  ;;  %v1092_v18 = vld [vmem:[#allocation7 + $0x18] sm:$0xff]  ;;  %v1083_v21 = vld [vmem:[#allocation5 + $0x50] sm:$0xff] }
  0x41   : > { %674 = vmatpush.bf16.msra.mxu2 %v1095_v6  ;;  %v1101_v15 = vld [vmem:[#allocation7 + $0x60] sm:$0xff]  ;;  %v1100_v19 = vld [vmem:[#allocation7 + $0x58] sm:$0xff]  ;;  %v1091_v22 = vld [vmem:[#allocation7 + $0x10] sm:$0xff] }
  0x42   : > { %687 = vmatpush.bf16.msra.mxu3 %v1103_v7  ;;  %v1099_v23 = vld [vmem:[#allocation7 + $0x50] sm:$0xff]  ;;  %v1074_v24 = vld [vmem:[#allocation5 + $0x8] sm:$0xff]  ;;  %v1073_v26 = vld [vmem:[#allocation5] sm:$0xff] }
  0x43   : > { %506 = vmatpush.bf16.msra.mxu0 %v1078_v8  ;;  %v1082_v25 = vld [vmem:[#allocation5 + $0x48] sm:$0xff]  ;;  %v536_v28 = vld [vmem:[%s354_s21] sm:$0x3]  ;;  %v1071_v33 = vld [vmem:[%s1489_s2 + $0x4] sm:$0xf]  ;;  %s1285_s21 = sshra.s32 %s796_s19, 4  ;;  %s1286_s21 = int_to_ptr.hbm [resolvable:$true] %s1285_s21 }
  0x44   : > { %520 = vmatpush.bf16.msra.mxu1 %v1086_v9  ;;  %v1090_v27 = vld [vmem:[#allocation7 + $0x8] sm:$0xff]  ;;  %v1081_v29 = vld [vmem:[#allocation5 + $0x40] sm:$0xff]  ;;  %v538_v35 = vperm.slane %v536_v28, 0  ;;  %v539_v39 = vperm.slane %v536_v28, 1  ;;  %s1287_s23 = scalar_lea.hbm %s1286_s21, 1  ;;  %p1292_p2 = scmp.lt.s32.totalorder %s1286_s21, %s1568_s7 }
  0x45   : > { %675 = vmatpush.bf16.msra.mxu2 %v1094_v10  ;;  %v932_v30 = vld [vmem:[%s1489_s2] sm:$0xf]  ;;  %v1098_v31 = vld [vmem:[#allocation7 + $0x48] sm:$0xff]  ;;  %p1288_p4 = scmp.ne.s32.totalorder %s1286_s21, %s1287_s23  ;;  %p1293_p9 = scmp.lt.s32.totalorder %s1291_s17, %s1287_s23 }
  0x46   : > { %688 = vmatpush.bf16.msra.mxu3 %v1102_v11  ;;  %v1072_v32 = vld [vmem:[%s1489_s2 + $0x4] sm:$0xf0]  ;;  %v934_v34 = vld [vmem:[%s1489_s2 + $0x8] sm:$0xf0]  ;;  %v1089_v36 = vld [vmem:[#allocation7] sm:$0xff]  ;;  %v542_v41 = vpack.c.bf16 %v538_v35, %v538_v35  ;;  %v543_v42 = vpack.c.bf16 %v539_v39, %v539_v39  ;;  %s793_s2 = sshll.u32 %s350_s11, 4  ;;  %s794_s2 = int_to_ptr.vmem [resolvable:$true] %s793_s2 }
  0x47   : > { %507 = vmatpush.bf16.msra.mxu0 %v1077_v12  ;;  %v933_v37 = vor.u32 %v1072_v32, %v932_v30  ;;  %v937_v38 = vor.u32 %v1071_v33, %v934_v34  ;;  %v1097_v40 = vld [vmem:[#allocation7 + $0x40] sm:$0xff]  ;;  %p1289_p8 = pnand %p1288_p4, %p1455_p3  ;;  %p1294_p10 = por %p1293_p9, %p1292_p2 }
  0x48   : > { %521 = vmatpush.bf16.msra.mxu1 %v1085_v13  ;;  %v1176_v43 = vld [vmem:[%s1564_s3] ss:$0 sm:$0xff] }
  0x49   : > { %676 = vmatpush.bf16.msra.mxu2 %v1093_v14  ;;  %v576_v51 = vld [vmem:[%s1566_s5] sm:$0x1]  ;;  %p1290_p11 = pneg %p1289_p8 }
  0x4a   : > { %689 = vmatpush.bf16.msra.mxu3 %v1101_v15 }
  0x4b   : > { %508 = vmatpush.bf16.msra.mxu0 %v1076_v16  ;;  %p1295_p12 = pnand %p1294_p10, %p1290_p11 }
  0x4c   : > { %522 = vmatpush.bf16.msra.mxu1 %v1084_v17 }
  0x4d   : > { %677 = vmatpush.bf16.msra.mxu2 %v1092_v18 }
  0x4e   : > { %690 = vmatpush.bf16.msra.mxu3 %v1100_v19 }
  0x4f   : > { %509 = vmatpush.bf16.msra.mxu0 %v1075_v20 }
  0x50   : > { %523 = vmatpush.bf16.msra.mxu1 %v1083_v21 }
  0x51   : > { %678 = vmatpush.bf16.msra.mxu2 %v1091_v22 }
  0x52   : > { %691 = vmatpush.bf16.msra.mxu3 %v1099_v23 }
  0x53   : > { %510 = vmatpush.bf16.msra.mxu0 %v1074_v24 }
  0x54   : > { %524 = vmatpush.bf16.msra.mxu1 %v1082_v25 }
  0x55   : > { %679 = vmatpush.bf16.msra.mxu2 %v1090_v27 }
  0x56   : > { %692 = vmatpush.bf16.msra.mxu3 %v1098_v31 }
  0x57   : > { %511 = vmatpush.bf16.msra.mxu0 %v1073_v26 }
  0x58   : > { %525 = vmatpush.bf16.msra.mxu1 %v1081_v29 }
  0x59   : > { %680 = vmatpush.bf16.msra.mxu2 %v1089_v36 }
  0x5a   : > { %512 = vmatmul.bf16.vlgmr.msra.gmra.mxu0 %v933_v37  ;;  %693 = vmatpush.bf16.msra.mxu3 %v1097_v40 }
  0x5b   : > { %526 = vmatmul.bf16.vlgmr.msra.gmra.mxu1 %v937_v38 }
  0x5c   : > { %745 = vmatpush.bf16.msrb.mxu1 %v933_v37  ;;  %681 = vmatmul.bf16.vlgmr.msra.gmra.mxu2 %v542_v41 }
  0x5d   : > { %758 = vmatpush.bf16.msrb.mxu2 %v937_v38  ;;  %694 = vmatmul.bf16.vlgmr.msra.gmra.mxu3 %v543_v42 }
  0xd7   : > { %v513_v44 = vpop.f32.mrf.mxu0 }
  0xd8   : > { %v527_v45 = vpop.f32.mrf.mxu1  ;;  %v514_v46 = vadd.f32 %v1176_v43, %v513_v44 }
  0xda   : > { %v528_v47 = vadd.f32 %v527_v45, %v514_v46 }
  0xdc   : > { %v532_v49 = vmax.f32 %v528_v47, 0.0 }
  0xde   : > { %v534_v57 = vpack.c.bf16 %v532_v49, %v532_v49 }
  0xdf   : > { %v515_v48 = vpop.f32.mrf.mxu0  ;;  %v682_v52 = vpop.f32.mrf.mxu2 }
  0xe0   : > { %v516_v50 = vadd.f32 %v1176_v43, %v515_v48  ;;  %v529_v53 = vpop.f32.mrf.mxu1  ;;  %v695_v54 = vpop.f32.mrf.mxu3  ;;  %v683_v56 = vadd.f32 %v682_v52, %v576_v51  ;;  %v703_v61 = vunpack.c.l.b16 %v534_v57 }
  0xe2   : > { %v530_v55 = vadd.f32 %v529_v53, %v516_v50  ;;  %v696_v60 = vadd.f32 %v695_v54, %v683_v56 }
  0xe4   : > { %v533_v58 = vmax.f32 %v530_v55, 0.0  ;;  %v699_v2 = vmax.f32 %v696_v60, 0.0 }
  0xe6   : > { %v535_v59 = vpack.c.bf16 %v533_v58, %v533_v58  ;;  %v700_v3 = vpack.c.bf16 %v699_v2, %v699_v2 }
  0xe7   : > { %v684_v63 = vpop.f32.mrf.mxu2 }
  0xe8   : > { %v704_v62 = vunpack.c.l.b16 %v535_v59  ;;  %v697_v0 = vpop.f32.mrf.mxu3 }
  0xea   : > { %v705_v1 = vpack.c.b16 %v704_v62, %v703_v61 }
  0xec   : > { %714 = vmatpush.bf16.xpose.msrb.mxu0 %v705_v1 }
  0xf3   : > { %715 = vmatmul.bf16.vlgmr.msrb.gmra.mxu0 %v700_v3 }
 0x170   : > { %v716_v4 = vpop.f32.mrf.mxu0 }
 0x171   : > { %v721_v5 = vsel %vm720_vm0, %v716_v4, -inf }
 0x172   : > { %722 = vmax.xlane.f32.xlu0 %v721_v5 }
 0x178   : > { %v718_v6 = vpop.f32.mrf.mxu0 }
 0x1e5   : > { %v723_v7 = vpop.xlane.xlu0 %722 }
 0x1e6   : > { %v724_v8 = vsub.f32 %v716_v4, %v723_v7 }
 0x1e8   : > { %v725_v9 = vmul.f32 1.442695, %v724_v8 }
 0x1ea   : > { %1177 = vpow2.f32 %v725_v9 }
 0x1f0   : > { %v1178_v10 = vpop.eup %1177 }
 0x1f1   : > { %v727_v11 = vsel %vm720_vm0, %v1178_v10, 0.0 }
 0x1f2   : > { %728 = vadd.xlane.f32.xlu0 %v727_v11 }
 0x265   : > { %v729_v12 = vpop.xlane.xlu0 %728 }
 0x266   : > { %1179 = vrcp.f32 %v729_v12 }
 0x26c   : > { %v1180_v13 = vpop.eup %1179 }
 0x26d   : > { %v731_v14 = vmul.f32 %v1180_v13, %v1178_v10 }
 0x26f   : > { %v733_v15 = vpack.c.bf16 %v731_v14, %v731_v14  ;;  %732 = vst.msk [vmem:[%s350_s11] sm:$0x1] %vm720_vm0, %v731_v14 }
 0x271   : > { %1066 = vmatmul.msk.bf16.vlgmr.msrb.gmra.mxu1 %vm734_vm1, %v733_v15  ;;  %1067 = vmatmul.msk.bf16.vlgmr.msrb.gmra.mxu2 %vm734_vm1, %v733_v15 }
 0x272   : > { %1298 = shalt.err (!%p1295_p12)
}
 0x273   : > { %1115 = dma.vmem_to_hbm [thread:$0]  (%p1455_p3), %s794_s2, 16, %s796_s19, %s780_s20   ;;  %v770_v17 = vlaneseq  ;;  %vm767_vm2 = vcmask 1040384  }
 0x274   : > { %s1579_s28 = sshll.u32 %s1501_s30, 1 }
 0x275   : > { %s358_s18 = scalar_lea.vmem %s1567_s6, %s1579_s28  ;;  %vm772_vm3 = vcmp.lt.s32.totalorder %v770_v17, 256 }
 0x2ee   : > { %v747_v16 = vpop.f32.mrf.mxu1 }
 0x2f4   : > { %v760_v18 = vpop.f32.mrf.mxu2 }
 0x2f5   : > { %v766_v19 = vrot.slane %v760_v18, 7 }
 0x2f6   : > { %v749_v20 = vpop.f32.mrf.mxu1 }
 0x2f7   : > { %v768_v21 = vsel %vm767_vm2, %v747_v16, %v766_v19 }
 0x2f8   : > { %774 = vst.msk [vmem:[%s358_s18] sm:$0x3] %vm772_vm3, %v768_v21 }
 0x2fc   : > { %v762_v22 = vpop.f32.mrf.mxu2 }
 0x2fd PF: > { %s814_s0 = sand.u32 1, %s1329_s24   ;;  %p1580_p3 = scmp.ge.s32.totalorder %s1341_s27, 2 }
 0x2fe   : > { %s815_s9 = scalar_lea.sflag [#allocation4], %s814_s0 }
 0x2ff   : > { %p1129_p13 = pnand %p1580_p3, %p1424_p6 }
 0x301   : > { %p1130_p0 = pneg %p1129_p13 }
 0x303   : > { %1324 = dma.done.wait (%p1130_p0), %s815_s9, 16  }
 0x304   : > { %1326 = vsyncadd (%p1130_p0), %s815_s9, 4294967280  ;;  %p22_p5 = scmp.ge.s32.totalorder %s1445_s22, 4   ;;  %s1581_s24 = smov %s1333_s25 }
 0x305   : > { %s1582_s25 = smov %s1337_s26  ;;  %s1583_s26 = smov %s1461_s10 }
 0x306   : > { %s1584_s27 = smov %s1445_s22  ;;  %24 = sbr.rel (!%p22_p5) target bundleno = 9 (0x9), region = 112 }
 0x30b   :  { %820 = vsyncpa [#allocation3], 1 }
 0x30c   :  { %822 = vsyncpa [#allocation3 + $0x1], 1 }
 0x30d   :  { %823 = vsyncpa [#allocation6], 1 }
 0x30e   :  { %824 = vsyncpa [#allocation4], 1 }
 0x30f   :  { %826 = vsyncpa [#allocation4 + $0x1], 1 }

</bundles_post_ra>
